<compile_context>
chip_gen: v6e
topology: v6e:2x2x1
jax: 0.10.0
libtpu: 0.0.40
codegen_flags: <defaults>
</compile_context>

<pallas_src>
import functools

import jax
import jax.numpy as jnp
import numpy as np
from jax import lax
from jax.experimental import pallas as pl
from jax.experimental.pallas import tpu as pltpu


def _round_up(x, m):
    return (x + m - 1) // m * m


def _supcon_tile_loss(logits, pos_mask_f, nonself_bool):
    """Per-tile SupCon math.

    logits:       [TM, Nc] f32, already scaled by 1/temperature.
    pos_mask_f:   [TM, Nc] f32 positive mask (before self-exclusion).
    nonself_bool: [TM, Nc] bool, True where col != global anchor row.
    Returns [TM, 1] f32 per-anchor loss.
    """
    # Numerical-stability shift (matches torch: max over all columns, detached).
    logits = logits - jnp.max(logits, axis=1, keepdims=True)

    nonself_f = nonself_bool.astype(jnp.float32)
    exp_logits = jnp.where(nonself_bool, jnp.exp(logits), 0.0)
    log_denom = jnp.log(jnp.sum(exp_logits, axis=1, keepdims=True))  # [TM, 1]

    m = pos_mask_f * nonself_f                                        # [TM, Nc]
    pos_sum = jnp.sum(m * logits, axis=1, keepdims=True)              # [TM, 1]
    pos_cnt = jnp.sum(m, axis=1, keepdims=True)                       # [TM, 1]

    # sum(mask*(logits - log_denom)) / sum(mask) == pos_sum/pos_cnt - log_denom
    # (avoids materializing the [TM, Nc] log_prob temporary).
    # NOTE: pos_cnt == 0 (anchor with no positives) yields nan, exactly like
    # the reference PyTorch module.
    mean_log_prob_pos = pos_sum / pos_cnt - log_denom
    return -mean_log_prob_pos


def _supcon_kernel_ids(row_gid_ref, col_gid_ref, anchor_ref, contrast_ref,
                       loss_ref, *, inv_temperature, block_rows):
    """Labels / SimCLR path: masks rebuilt in-kernel from group ids."""
    i = pl.program_id(0)

    # Fold 1/temperature into the small [TM, D] anchor tile, feed the MXU with
    # bf16 operands, accumulate in f32.  NT contraction over D (no transpose).
    a = (anchor_ref[...] * inv_temperature).astype(jnp.bfloat16)      # [TM, D]
    c = contrast_ref[...]                                             # [Nc, D] bf16
    logits = lax.dot_general(
        a, c, dimension_numbers=(((1,), (1,)), ((), ())),
        preferred_element_type=jnp.float32)                           # [TM, Nc]

    tm, nc = logits.shape
    row_idx = lax.broadcasted_iota(jnp.int32, (tm, 1), 0) + i * block_rows
    col_idx = lax.broadcasted_iota(jnp.int32, (1, nc), 1)
    nonself = row_idx != col_idx                                      # [TM, Nc]
    pos = (row_gid_ref[...] == col_gid_ref[...]).astype(jnp.float32)  # [TM, Nc]

    loss_ref[...] = _supcon_tile_loss(logits, pos, nonself)


def _supcon_kernel_mask(anchor_ref, contrast_ref, mask_ref, loss_ref,
                        *, inv_temperature, block_rows):
    """Explicit user-supplied mask path: row-tiled [TM, Nc] float mask input."""
    i = pl.program_id(0)

    a = (anchor_ref[...] * inv_temperature).astype(jnp.bfloat16)
    c = contrast_ref[...]
    logits = lax.dot_general(
        a, c, dimension_numbers=(((1,), (1,)), ((), ())),
        preferred_element_type=jnp.float32)

    tm, nc = logits.shape
    row_idx = lax.broadcasted_iota(jnp.int32, (tm, 1), 0) + i * block_rows
    col_idx = lax.broadcasted_iota(jnp.int32, (1, nc), 1)
    nonself = row_idx != col_idx

    loss_ref[...] = _supcon_tile_loss(logits, mask_ref[...], nonself)


def supcon_loss(features, labels=None, mask=None, *,
                temperature=0.07, contrast_mode="all", block_rows=256):
    """JAX/Pallas equivalent of SupConLoss.forward.

    features: [bsz, n_views, ...] (extra dims flattened to D)
    labels:   optional [bsz] int labels
    mask:     optional [bsz, bsz] float mask
    returns:  [anchor_count, bsz] float32 (same as the PyTorch module)
    """
    if features.ndim < 3:
        raise ValueError("`features` needs to be [bsz, n_views, ...]")
    if features.ndim > 3:
        features = features.reshape(features.shape[0], features.shape[1], -1)
    features = features.astype(jnp.float32)
    bsz, n_views, d = features.shape

    if labels is not None and mask is not None:
        raise ValueError("Cannot define both `labels` and `mask`")

    contrast_count = n_views
    # torch.cat(torch.unbind(features, 1), 0) -> view-major stacking [Nc, D]
    contrast_feature = jnp.concatenate(
        [features[:, v, :] for v in range(n_views)], axis=0)

    if contrast_mode == "one":
        anchor_feature = features[:, 0, :]
        anchor_count = 1
    elif contrast_mode == "all":
        anchor_feature = contrast_feature
        anchor_count = contrast_count
    else:
        raise ValueError(f"Unknown mode: {contrast_mode}")

    n_anchor = anchor_count * bsz
    n_contrast = contrast_count * bsz

    # Pad the feature (lane) dim to a multiple of 128: zero padding does not
    # change dot products and keeps the MXU contraction dim lane-aligned.
    d_pad = max(128, _round_up(d, 128))
    if d_pad != d:
        fpad = [(0, 0), (0, d_pad - d)]
        anchor_feature = jnp.pad(anchor_feature, fpad)
        contrast_feature = jnp.pad(contrast_feature, fpad)

    # Row tiling over anchors.  Small problems use a single full-size tile;
    # large problems use block_rows-sized tiles with zero-padded anchor rows
    # (padded rows produce garbage/nan loss rows that are sliced off below).
    if n_anchor <= block_rows:
        tm = n_anchor
        n_anchor_pad = n_anchor
    else:
        tm = block_rows
        n_anchor_pad = _round_up(n_anchor, tm)
    grid = (n_anchor_pad // tm,)

    if n_anchor_pad != n_anchor:
        anchor_feature = jnp.pad(
            anchor_feature, [(0, n_anchor_pad - n_anchor), (0, 0)])

    contrast_bf16 = contrast_feature.astype(jnp.bfloat16)
    inv_temp = 1.0 / float(temperature)

    common = dict(
        out_shape=jax.ShapeDtypeStruct((n_anchor_pad, 1), jnp.float32),
        grid=grid,
        out_specs=pl.BlockSpec((tm, 1), lambda i: (i, 0)),
        compiler_params=pltpu.CompilerParams(
            dimension_semantics=("parallel",),
            vmem_limit_bytes=48 * 1024 * 1024),
    )

    if mask is None:
        # labels path (positives = equal labels) or SimCLR path (eye mask).
        if labels is None:
            base_gid = jnp.arange(bsz, dtype=jnp.int32)
        else:
            labels = jnp.asarray(labels).reshape(-1)
            if labels.shape[0] != bsz:
                raise ValueError("Num of labels does not match num of features")
            base_gid = labels.astype(jnp.int32)

        col_gid = jnp.tile(base_gid, contrast_count).reshape(1, n_contrast)
        row_gid = jnp.tile(base_gid, anchor_count)
        if n_anchor_pad != n_anchor:
            row_gid = jnp.pad(row_gid, (0, n_anchor_pad - n_anchor),
                              constant_values=-1)  # padded rows are discarded
        row_gid = row_gid.reshape(n_anchor_pad, 1)

        kernel = functools.partial(_supcon_kernel_ids,
                                   inv_temperature=inv_temp, block_rows=tm)
        loss_col = pl.pallas_call(
            kernel,
            in_specs=[
                pl.BlockSpec((tm, 1), lambda i: (i, 0)),              # row gid
                pl.BlockSpec((1, n_contrast), lambda i: (0, 0)),      # col gid
                pl.BlockSpec((tm, d_pad), lambda i: (i, 0)),          # anchor
                pl.BlockSpec((n_contrast, d_pad), lambda i: (0, 0)),  # contrast
            ],
            **common,
        )(row_gid, col_gid, anchor_feature, contrast_bf16)
    else:
        # Explicit (possibly asymmetric / non-binary) user mask: stream a
        # row-tiled repeated mask.
        mask = jnp.asarray(mask, dtype=jnp.float32)
        mask_rep = jnp.tile(mask, (anchor_count, contrast_count))
        if n_anchor_pad != n_anchor:
            mask_rep = jnp.pad(mask_rep,
                               [(0, n_anchor_pad - n_anchor), (0, 0)])

        kernel = functools.partial(_supcon_kernel_mask,
                                   inv_temperature=inv_temp, block_rows=tm)
        loss_col = pl.pallas_call(
            kernel,
            in_specs=[
                pl.BlockSpec((tm, d_pad), lambda i: (i, 0)),          # anchor
                pl.BlockSpec((n_contrast, d_pad), lambda i: (0, 0)),  # contrast
                pl.BlockSpec((tm, n_contrast), lambda i: (i, 0)),     # mask
            ],
            **common,
        )(anchor_feature, contrast_bf16, mask_rep)

    loss = loss_col[:n_anchor, 0]
    return loss.reshape(anchor_count, bsz)


def _supcon_loss_ref(features, labels=None, mask=None, *, temperature=0.07,
                     contrast_mode="all"):
    """Pure-JAX f32 reference (mirrors the torch code) for correctness check."""
    features = features.reshape(features.shape[0], features.shape[1], -1)
    features = features.astype(jnp.float32)
    bsz, n_views, _ = features.shape
    if mask is None:
        if labels is None:
            mask = jnp.eye(bsz, dtype=jnp.float32)
        else:
            labels = labels.reshape(-1, 1)
            mask = jnp.equal(labels, labels.T).astype(jnp.float32)
    else:
        mask = mask.astype(jnp.float32)
    contrast = jnp.concatenate([features[:, v] for v in range(n_views)], 0)
    if contrast_mode == "one":
        anchor, anchor_count = features[:, 0], 1
    else:
        anchor, anchor_count = contrast, n_views
    adc = jnp.matmul(anchor, contrast.T,
                     precision=jax.lax.Precision.HIGHEST) / temperature
    logits = adc - jnp.max(adc, axis=1, keepdims=True)
    mask = jnp.tile(mask, (anchor_count, n_views))
    lmask = 1.0 - jnp.eye(anchor_count * bsz, n_views * bsz, dtype=jnp.float32)
    mask = mask * lmask
    exp_logits = jnp.exp(logits) * lmask
    log_prob = logits - jnp.log(jnp.sum(exp_logits, 1, keepdims=True))
    mlpp = jnp.sum(mask * log_prob, 1) / jnp.sum(mask, 1)
    return (-mlpp).reshape(anchor_count, bsz)


if __name__ == "__main__":
    key = jax.random.PRNGKey(0)
    kf, kl = jax.random.split(key)

    bsz, n_views, d = 8, 2, 32
    features = jax.random.normal(kf, (bsz, n_views, d), dtype=jnp.float32)
    # L2-normalize along feature dim, as usual for SupCon inputs.
    features = features / jnp.linalg.norm(features, axis=-1, keepdims=True)
    labels = jax.random.randint(kl, (bsz,), 0, 3, dtype=jnp.int32)

    # Tolerance is 5e-2 because the kernel uses the TPU-native bf16 MXU path
    # (f32 accumulation) while the reference matmul is full f32.

    # 1) Supervised path (labels) -> masks built in-kernel from group ids.
    loss_sup = jax.block_until_ready(
        supcon_loss(features, labels=labels, temperature=0.07,
                    contrast_mode="all"))
    ref_sup = _supcon_loss_ref(features, labels=labels, temperature=0.07)
    np.testing.assert_allclose(np.asarray(loss_sup), np.asarray(ref_sup),
                               rtol=5e-2, atol=5e-2)

    # 2) Unsupervised SimCLR path (labels=None -> eye mask).
    loss_unsup = jax.block_until_ready(
        supcon_loss(features, temperature=0.07, contrast_mode="all"))
    ref_unsup = _supcon_loss_ref(features, labels=None, temperature=0.07)
    np.testing.assert_allclose(np.asarray(loss_unsup), np.asarray(ref_unsup),
                               rtol=5e-2, atol=5e-2)

    # 3) Explicit user-supplied mask path (same mask as the labels case).
    user_mask = jnp.equal(labels.reshape(-1, 1),
                          labels.reshape(1, -1)).astype(jnp.float32)
    loss_mask = jax.block_until_ready(
        supcon_loss(features, mask=user_mask, temperature=0.07,
                    contrast_mode="all"))
    np.testing.assert_allclose(np.asarray(loss_mask), np.asarray(ref_sup),
                               rtol=5e-2, atol=5e-2)

    print("KERNEL_OK")
</pallas_src>

<mosaic_0001>
module attributes {stable_mosaic.version = 11 : i64} {
  func.func @_supcon_kernel_ids(%arg0: i32, %arg1: memref<16x1xi32, #tpu.memory_space<vmem>>, %arg2: memref<1x16xi32, #tpu.memory_space<vmem>>, %arg3: memref<16x128xf32, #tpu.memory_space<vmem>>, %arg4: memref<16x128xbf16, #tpu.memory_space<vmem>>, %arg5: memref<16x1xf32, #tpu.memory_space<vmem>>) attributes {dimension_semantics = [#tpu.dimension_semantics<parallel>], iteration_bounds = array<i64: 1>, scalar_prefetch = 0 : i64, scratch_operands = 0 : i64, tpu.core_type = #tpu.core_type<tc>, window_params = [{transform_indices = @transform_0, window_bounds = array<i64: 16, 1>}, {pipeline_mode = #tpu.pipeline_mode<synchronous>, transform_indices = @transform_1, window_bounds = array<i64: 1, 16>}, {transform_indices = @transform_2, window_bounds = array<i64: 16, 128>}, {pipeline_mode = #tpu.pipeline_mode<synchronous>, transform_indices = @transform_3, window_bounds = array<i64: 16, 128>}, {transform_indices = @transform_4, window_bounds = array<i64: 16, 1>}]} {
    %c0 = arith.constant 0 : index
    %c0_0 = arith.constant 0 : index
    %0 = vector.load %arg3[%c0, %c0_0] : memref<16x128xf32, #tpu.memory_space<vmem>>, vector<16x128xf32>
    %cst = arith.constant 14.2857141 : f32
    %1 = vector.broadcast %cst : f32 to vector<16x128xf32>
    %2 = arith.mulf %0, %1 : vector<16x128xf32>
    %3 = arith.truncf %2 : vector<16x128xf32> to vector<16x128xbf16>
    %c0_1 = arith.constant 0 : index
    %c0_2 = arith.constant 0 : index
    %4 = vector.load %arg4[%c0_1, %c0_2] : memref<16x128xbf16, #tpu.memory_space<vmem>>, vector<16x128xbf16>
    %cst_3 = arith.constant dense<0.000000e+00> : vector<16x16xf32>
    %5 = tpu.matmul %3, %4, %cst_3 {dimension_numbers = #tpu.dot_dimension_numbers<[1], [1], [0], [0], [0, 0, 1, 0], [], []>} : vector<16x128xbf16>, vector<16x128xbf16>, vector<16x16xf32> -> vector<16x16xf32>
    %6 = tpu.iota {dimensions = array<i32: 0>} : vector<16x1xi32>
    %c16_i32 = arith.constant 16 : i32
    %7 = arith.muli %arg0, %c16_i32 : i32
    %8 = vector.broadcast %7 : i32 to vector<16x1xi32>
    %9 = arith.addi %6, %8 : vector<16x1xi32>
    %10 = tpu.iota {dimensions = array<i32: 1>} : vector<1x16xi32>
    %11 = vector.broadcast %9 : vector<16x1xi32> to vector<16x16xi32>
    %12 = vector.broadcast %10 : vector<1x16xi32> to vector<16x16xi32>
    %13 = arith.cmpi ne, %11, %12 : vector<16x16xi32>
    %c0_4 = arith.constant 0 : index
    %c0_5 = arith.constant 0 : index
    %14 = vector.load %arg1[%c0_4, %c0_5] : memref<16x1xi32, #tpu.memory_space<vmem>>, vector<16x1xi32>
    %c0_6 = arith.constant 0 : index
    %c0_7 = arith.constant 0 : index
    %15 = vector.load %arg2[%c0_6, %c0_7] : memref<1x16xi32, #tpu.memory_space<vmem>>, vector<1x16xi32>
    %16 = vector.broadcast %14 : vector<16x1xi32> to vector<16x16xi32>
    %17 = vector.broadcast %15 : vector<1x16xi32> to vector<16x16xi32>
    %18 = arith.cmpi eq, %16, %17 : vector<16x16xi32>
    %19 = arith.extui %18 : vector<16x16xi1> to vector<16x16xi32>
    %20 = arith.sitofp %19 : vector<16x16xi32> to vector<16x16xf32>
    %cst_8 = arith.constant dense<0xFF800000> : vector<16xf32>
    %21 = vector.multi_reduction <maximumf>, %5, %cst_8 [1] : vector<16x16xf32> to vector<16xf32>
    %22 = vector.shape_cast %21 : vector<16xf32> to vector<16x1xf32>
    %23 = vector.broadcast %22 : vector<16x1xf32> to vector<16x16xf32>
    %24 = arith.subf %5, %23 : vector<16x16xf32>
    %25 = arith.extui %13 : vector<16x16xi1> to vector<16x16xi32>
    %26 = arith.sitofp %25 : vector<16x16xi32> to vector<16x16xf32>
    %27 = math.exp %24 : vector<16x16xf32>
    %cst_9 = arith.constant 0.000000e+00 : f32
    %28 = vector.broadcast %cst_9 : f32 to vector<16x16xf32>
    %29 = arith.select %13, %27, %28 : vector<16x16xi1>, vector<16x16xf32>
    %cst_10 = arith.constant dense<0.000000e+00> : vector<16xf32>
    %30 = vector.multi_reduction <add>, %29, %cst_10 [1] : vector<16x16xf32> to vector<16xf32>
    %31 = vector.shape_cast %30 : vector<16xf32> to vector<16x1xf32>
    %32 = math.log %31 : vector<16x1xf32>
    %33 = arith.mulf %20, %26 : vector<16x16xf32>
    %34 = arith.mulf %33, %24 : vector<16x16xf32>
    %cst_11 = arith.constant dense<0.000000e+00> : vector<16xf32>
    %35 = vector.multi_reduction <add>, %34, %cst_11 [1] : vector<16x16xf32> to vector<16xf32>
    %36 = vector.shape_cast %35 : vector<16xf32> to vector<16x1xf32>
    %cst_12 = arith.constant dense<0.000000e+00> : vector<16xf32>
    %37 = vector.multi_reduction <add>, %33, %cst_12 [1] : vector<16x16xf32> to vector<16xf32>
    %38 = vector.shape_cast %37 : vector<16xf32> to vector<16x1xf32>
    %39 = arith.divf %36, %38 : vector<16x1xf32>
    %40 = arith.subf %39, %32 : vector<16x1xf32>
    %cst_13 = arith.constant 0.000000e+00 : f32
    %41 = vector.broadcast %cst_13 : f32 to vector<16x1xf32>
    %42 = arith.subf %41, %40 : vector<16x1xf32>
    %c0_14 = arith.constant 0 : index
    %c0_15 = arith.constant 0 : index
    %43 = vector.load %arg5[%c0_14, %c0_15] : memref<16x1xf32, #tpu.memory_space<vmem>>, vector<16x1xf32>
    tpu.vector_store %arg5[%c0_14, %c0_15], %42 {strides = array<i32>} : memref<16x1xf32, #tpu.memory_space<vmem>>, vector<16x1xf32>,
    return
  }
  func.func @transform_0(%arg0: i32) -> (i32, i32) {
    %c0_i32 = arith.constant 0 : i32
    %c0_i32_0 = arith.constant 0 : i32
    return %arg0, %c0_i32 : i32, i32
  }
  func.func @transform_1(%arg0: i32) -> (i32, i32) {
    %c0_i32 = arith.constant 0 : i32
    %c0_i32_0 = arith.constant 0 : i32
    %c0_i32_1 = arith.constant 0 : i32
    return %c0_i32, %c0_i32_0 : i32, i32
  }
  func.func @transform_2(%arg0: i32) -> (i32, i32) {
    %c0_i32 = arith.constant 0 : i32
    %c0_i32_0 = arith.constant 0 : i32
    return %arg0, %c0_i32 : i32, i32
  }
  func.func @transform_3(%arg0: i32) -> (i32, i32) {
    %c0_i32 = arith.constant 0 : i32
    %c0_i32_0 = arith.constant 0 : i32
    %c0_i32_1 = arith.constant 0 : i32
    return %c0_i32, %c0_i32_0 : i32, i32
  }
  func.func @transform_4(%arg0: i32) -> (i32, i32) {
    %c0_i32 = arith.constant 0 : i32
    %c0_i32_0 = arith.constant 0 : i32
    return %arg0, %c0_i32 : i32, i32
  }
}

</mosaic_0001>

<bundles_post_ra>
// kernel: tpu_custom_call.1
= control target key start
LH: loop header
LB: loop body
LE: loop exit
PB: predicated region body
PF: predicated region fallthrough
CT: control target
= control target key end

     0   :  { %9 = vsyncpa [#allocation3], 0  ;;  %s234_s15 = smov [#allocation2]   ;;  %s297_s0 = inlined_call_operand.vmem [shape: s32[16,1], index: 0, kind: input, shape index: {}]   ;;  %s298_s1 = inlined_call_operand.vmem [shape: s32[1,16], index: 1, kind: input, shape index: {}]   ;;  %s299_s2 = inlined_call_operand.vmem [shape: f32[16,128], index: 2, kind: input, shape index: {}]   ;;  %s300_s3 = inlined_call_operand.hbm [shape: bf16[16,128], index: 3, kind: input, shape index: {}]   ;;  %s301_s4 = inlined_call_operand.vmem [shape: f32[16,1], index: 4, kind: output, shape index: {}]  }
   0x1   :  { %s21_s16 = sshll.u32 %s234_s15, 4  ;;  %s22_s16 = int_to_ptr.vmem [resolvable:$true] %s21_s16 }
   0x2   :  { %s220_s17 = scalar_lea.vmem %s22_s16, 128  ;;  %p225_p1 = scmp.lt.s32.totalorder %s22_s16, %s22_s16 }
   0x3   :  { %p221_p0 = scmp.ne.s32.totalorder %s22_s16, %s220_s17  ;;  %p226_p2 = scmp.lt.s32.totalorder %s220_s17, %s220_s17 }
   0x5   :  { %p227_p3 = por %p226_p2, %p225_p1 }
   0x7   :  { %p228_p4 = pnand %p227_p3, %p221_p0 }
   0x9   :  { %231 = shalt.err (!%p228_p4)
}
   0xa   :  { %s235_s18 = smov 64   ;;  %s236_s19 = smov 4  }
   0xb   :  { %27 = dma.hbm_to_vmem [thread:$0]  %s300_s3, 128, %s22_s16, [#allocation3], %s235_s18, %s235_s18, %s236_s19  }
   0xc   :  { %232 = dma.done.wait [#allocation3], 128  }
   0xd   :  { %233 = vsyncadd [#allocation3], 4294967168  ;;  %v237_v0 = vmov 0.0   ;;  %vm238_vm0 = vmmov 0   ;;  %v199_v1 = vld [vmem:[#allocation2] sm:$0xff]   ;;  %v33_v3 = vld [vmem:[%s299_s2 + $0x8] sm:$0xff]  ;;  %v86_v21 = vlaneseq }
   0xe   :  { %185 = vmatprep.subr.bf16.mxu0 %v237_v0  ;;  %187 = vmatprep.mubr.msk.bf16.mxu0 %vm238_vm0, %v237_v0  ;;  %v32_v2 = vld [vmem:[%s299_s2] sm:$0xff]  ;;  %v35_v5 = vmul.f32 14.285714, %v33_v3  ;;  %v239_v8 = vmov 0   ;;  %v98_v9 = vld [vmem:[%s297_s0 + $0x8] sm:$0xff]  ;;  %vm116_vm1 = vcmask 130048  }
   0xf   :  { %186 = vmatpush3.bf16.xpose.msra.mxu0 %v199_v1  ;;  %v34_v4 = vmul.f32 14.285714, %v32_v2  ;;  %v97_v7 = vld [vmem:[%s297_s0] sm:$0xff]  ;;  %197 = vset.pattern.permute.xlu1 %v239_v8  ;;  %v87_v23 = vshrl.u32 %v86_v21, 7  ;;  %v94_v24 = vand.u32 127, %v86_v21  ;;  %vm169_vm6 = vcmask 7168  }
  0x10   :  { %198 = vset.pattern.permute.xlu0 %v239_v8  ;;  %101 = vperm.xlu1 %197, %v97_v7   ;;  %v178_v25 = vld [vmem:[%s298_s1] ss:$0 sm:$0xff] }
  0x11   :  { %v36_v6 = vpack.c.bf16 %v35_v5, %v34_v4  ;;  %vm95_vm3 = vcmp.ne.s32.totalorder %v87_v23, %v94_v24  ;;  %v88_v27 = vadd.s32 8, %v87_v23 }
  0x12   :  { %v181_v30 = vsel %vm95_vm3, 1.0, %v237_v0 }
  0x13   :  { %vm96_vm5 = vcmp.ne.s32.totalorder %v88_v27, %v94_v24 }
  0x14   :  { %104 = vperm.xlu1 %197, %v98_v9   ;;  %v182_v39 = vsel %vm96_vm5, 1.0, %v237_v0 }
  0x16   :  { %188 = vmatmul.mubr.bf16.vlgmr.msra.gmra.mxu0 %v36_v6 }
  0x8b   :  { %v102_v26 = vpop.permute.xlu1 %101 }
  0x8c   :  { %vm110_vm2 = vcmp.eq.s32.totalorder %v102_v26, %v178_v25 }
  0x8d   :  { %v179_v28 = vsel %vm110_vm2, 1.0, %v237_v0 }
  0x8e   :  { %v145_v34 = vmul.f32 %v181_v30, %v179_v28 }
  0x8f   :  { %v105_v29 = vpop.permute.xlu1 %104 }
  0x90   :  { %vm111_vm4 = vcmp.eq.s32.totalorder %v105_v29, %v178_v25  ;;  %v155_v36 = vsel %vm116_vm1, %v145_v34, 0.0 }
  0x91   :  { %v180_v37 = vsel %vm111_vm4, 1.0, %v237_v0 }
  0x92   :  { %v146_v41 = vmul.f32 %v182_v39, %v180_v37 }
  0x94   :  { %v158_v42 = vsel %vm116_vm1, %v146_v41, 0.0 }
  0xd6   :  { %v79_v10 = vpop.f32.mrf.mxu0 }
  0xd7   :  { %v117_v11 = vsel %vm116_vm1, %v79_v10, -inf }
  0xd8   :  { %118 = vmax.xlane.f32.xlu0 %v117_v11  ;;  %v189_v12 = vpop.f32.mrf.mxu0 }
  0xda   :  { %v82_v13 = vpop.f32.mrf.mxu0 }
  0xdb   :  { %v120_v14 = vsel %vm116_vm1, %v82_v13, -inf }
  0xdc   :  { %121 = vmax.xlane.f32.xlu0 %v120_v14  ;;  %v190_v15 = vpop.f32.mrf.mxu0 }
 0x161   :  { %v119_v16 = vpop.xlane.xlu0 %118 }
 0x162   :  { %v123_v17 = vsub.f32 %v79_v10, %v119_v16 }
 0x164   :  { %v129_v18 = vmul.f32 1.442695, %v123_v17  ;;  %v147_v43 = vmul.f32 %v145_v34, %v123_v17 }
 0x165   :  { %v122_v19 = vpop.xlane.xlu0 %121 }
 0x166   :  { %200 = vpow2.f32 %v129_v18  ;;  %v124_v20 = vsub.f32 %v82_v13, %v122_v19  ;;  %v149_v44 = vsel %vm116_vm1, %v147_v43, 0.0 }
 0x168   :  { %v131_v22 = vmul.f32 1.442695, %v124_v20  ;;  %v148_v45 = vmul.f32 %v146_v41, %v124_v20 }
 0x16a   :  { %202 = vpow2.f32 %v131_v22  ;;  %v152_v46 = vsel %vm116_vm1, %v148_v45, 0.0 }
 0x173   :  { %v201_v31 = vpop.eup %200 }
 0x174   :  { %v133_v32 = vsel %vm95_vm3, %v201_v31, 0.0 }
 0x175   :  { %v135_v33 = vsel %vm116_vm1, %v133_v32, 0.0 }
 0x176   :  { %136 = vadd.xlane.f32.xlu0 %v135_v33 }
 0x177   :  { %v203_v35 = vpop.eup %202 }
 0x178   :  { %v134_v38 = vsel %vm96_vm5, %v203_v35, 0.0 }
 0x179   :  { %v138_v40 = vsel %vm116_vm1, %v134_v38, 0.0 }
 0x17a   :  { %156 = vadd.xlane.f32.xlu0 %v155_v36  ;;  %139 = vadd.xlane.f32.xlu1 %v138_v40 }
 0x17e   :  { %159 = vadd.xlane.f32.xlu0 %v158_v42 }
 0x182   :  { %150 = vadd.xlane.f32.xlu0 %v149_v44 }
 0x186   :  { %153 = vadd.xlane.f32.xlu0 %v152_v46 }
 0x1ff   :  { %v137_v47 = vpop.xlane.xlu0 %136 }
 0x200   :  { %204 = vlog2.f32 %v137_v47 }
 0x203   :  { %v140_v48 = vpop.xlane.xlu1 %139  ;;  %v157_v49 = vpop.xlane.xlu0 %156 }
 0x204   :  { %206 = vrcp.f32 %v157_v49 }
 0x205   :  { %208 = vlog2.f32 %v140_v48 }
 0x207   :  { %v160_v50 = vpop.xlane.xlu0 %159 }
 0x208   :  { %210 = vrcp.f32 %v160_v50 }
 0x20b   :  { %v151_v51 = vpop.xlane.xlu0 %150 }
 0x20d   :  { %v205_v52 = vpop.eup %204 }
 0x20e   :  { %v142_v55 = vmul.f32 0.6931472, %v205_v52 }
 0x20f   :  { %v154_v59 = vpop.xlane.xlu0 %153 }
 0x211   :  { %v207_v53 = vpop.eup %206 }
 0x212   :  { %v209_v54 = vpop.eup %208  ;;  %v162_v56 = vmul.f32 %v207_v53, %v151_v51 }
 0x213   :  { %v144_v60 = vmul.f32 0.6931472, %v209_v54 }
 0x214   :  { %v165_v58 = vsub.f32 %v162_v56, %v142_v55 }
 0x215   :  { %v211_v57 = vpop.eup %210 }
 0x216   :  { %v164_v61 = vmul.f32 %v211_v57, %v154_v59  ;;  %v167_v62 = vsub.f32 0.0, %v165_v58 }
 0x218   :  { %v166_v63 = vsub.f32 %v164_v61, %v144_v60  ;;  %170 = vst.msk [vmem:[%s301_s4] sm:$0xff] %vm169_vm6, %v167_v62 }
 0x21a   :  { %v168_v0 = vsub.f32 0.0, %v166_v63 }
 0x21c   :  { %171 = vst.msk [vmem:[%s301_s4 + $0x8] sm:$0xff] %vm169_vm6, %v168_v0 }
 0x21d   :  { %176 = vsyncpa [#allocation3], 1 }

</bundles_post_ra>
